<compile_context>
chip_gen: v6e
topology: v6e:2x2x1
jax: 0.10.0
libtpu: 0.0.40
codegen_flags: <defaults>
</compile_context>

<pallas_src>
import functools

import jax
import jax.numpy as jnp
from jax.experimental import pallas as pl
from jax.experimental.pallas import tpu as pltpu


def _default_tb():
    """Generation-specific target batch tile (samples per grid step)."""
    try:
        kind = jax.devices()[0].device_kind.lower()
    except Exception:
        return 2048
    if "v5" in kind:
        return 1024
    if "v7" in kind:
        return 4096
    return 2048


def _local_op_kernel(s, x_ref, w1_ref, w2_ref, b1_ref, b2_ref, o_ref):
    rows, _ = x_ref.shape                # rows = tb * s
    c = w1_ref.shape[1]
    tb = rows // s

    x = x_ref[...]                                                    # (tb*s, d) bf16
    h = jnp.dot(x, w1_ref[...], preferred_element_type=jnp.float32)  # (tb*s, c) f32
    h = jnp.maximum(h + b1_ref[...], 0.0)                            # bn1(folded)+relu
    h = jnp.dot(h.astype(w2_ref.dtype), w2_ref[...],
                preferred_element_type=jnp.float32)                  # (tb*s, c) f32
    h = jnp.maximum(h + b2_ref[...], 0.0)                            # bn2(folded)+relu
    m = jnp.max(h.reshape(tb, s, c), axis=1)                         # (tb, c)
    o_ref[...] = m.T                                                 # lane-dense (c, tb)


def local_op_forward(x, params, *, eps=1e-5, tb=None):
    b, n, s, d = x.shape
    c = params["w1"].shape[0]
    bn = b * n

    if tb is None:
        tb = _default_tb()
    # Adaptive tile: cover small inputs with a single block; large inputs get
    # the chip-sized tile (which automatically yields >=2 grid steps).
    tb = min(tb, bn)

    num_blocks = pl.cdiv(bn, tb)
    bn_pad = num_blocks * tb

    # Glue: PyTorch does permute(0,1,3,2).reshape(-1, d, s); we keep channels
    # last instead -> (b*n, s, d), which is the transpose of (b*n, d, s).
    # Flatten to 2-D (bn_pad*s, d) and cast to bf16 (dominant HBM stream).
    x_flat = x.reshape(bn, s, d)
    if bn_pad != bn:
        x_flat = jnp.pad(x_flat, ((0, bn_pad - bn), (0, 0), (0, 0)))
    x_flat = x_flat.reshape(bn_pad * s, d).astype(jnp.bfloat16)

    # Fold inference-mode BatchNorm into the conv weights (scale) + shift.
    s1 = params["gamma1"] / jnp.sqrt(params["var1"] + eps)
    b1 = params["beta1"] - params["mean1"] * s1
    s2 = params["gamma2"] / jnp.sqrt(params["var2"] + eps)
    b2 = params["beta2"] - params["mean2"] * s2
    w1 = (params["w1"][..., 0].T * s1[None, :]).astype(jnp.bfloat16)  # (d, c)
    w2 = (params["w2"][..., 0].T * s2[None, :]).astype(jnp.bfloat16)  # (c, c)

    flops = 2 * bn_pad * s * (d * c + c * c)
    bytes_accessed = (2 * bn_pad * s * d          # bf16 x slab
                      + 2 * (d * c + c * c)       # bf16 weights
                      + 4 * (2 * c)               # f32 shifts
                      + 4 * c * bn_pad)           # f32 output

    kernel = functools.partial(_local_op_kernel, s)

    out = pl.pallas_call(
        kernel,
        out_shape=jax.ShapeDtypeStruct((c, bn_pad), jnp.float32),
        grid_spec=pltpu.PrefetchScalarGridSpec(
            num_scalar_prefetch=0,
            grid=(num_blocks,),
            in_specs=[
                pl.BlockSpec((tb * s, d), lambda i: (i, 0)),   # x slab (contiguous)
                pl.BlockSpec((d, c), lambda i: (0, 0)),        # W1*s1 (resident)
                pl.BlockSpec((c, c), lambda i: (0, 0)),        # W2*s2 (resident)
                pl.BlockSpec((1, c), lambda i: (0, 0)),        # bn1 shift
                pl.BlockSpec((1, c), lambda i: (0, 0)),        # bn2 shift
            ],
            out_specs=pl.BlockSpec((c, tb), lambda i: (0, i)),  # lane-dense store
        ),
        compiler_params=pltpu.CompilerParams(
            dimension_semantics=("parallel",)),
        cost_estimate=pl.CostEstimate(
            flops=flops, transcendentals=0, bytes_accessed=bytes_accessed),
    )(x_flat, w1, w2, b1.reshape(1, c), b2.reshape(1, c))

    # (c, bn_pad) -> (c, bn) -> (c, b, n) -> (b, c, n)  (matches .permute(0,2,1))
    return jnp.transpose(out[:, :bn].reshape(c, b, n), (1, 0, 2))


def local_op_reference(x, params, *, eps=1e-5):
    """Pure-JAX f32 reference of the same forward (inference-mode BN)."""
    b, n, s, d = x.shape
    c = params["w1"].shape[0]
    xf = x.reshape(b * n, s, d).astype(jnp.float32)
    w1 = params["w1"][..., 0].T
    w2 = params["w2"][..., 0].T
    s1 = params["gamma1"] / jnp.sqrt(params["var1"] + eps)
    b1 = params["beta1"] - params["mean1"] * s1
    s2 = params["gamma2"] / jnp.sqrt(params["var2"] + eps)
    b2 = params["beta2"] - params["mean2"] * s2
    h = jnp.maximum(jnp.einsum("bsd,dc->bsc", xf, w1) * s1 + b1, 0.0)
    h = jnp.maximum(jnp.einsum("bsc,ce->bse", h, w2) * s2 + b2, 0.0)
    o = jnp.max(h, axis=1)
    return jnp.transpose(o.reshape(b, n, c), (0, 2, 1))


def make_params(key, in_channels, out_channels):
    ks = jax.random.split(key, 8)
    c, d = out_channels, in_channels
    return {
        "w1": 0.1 * jax.random.normal(ks[0], (c, d, 1), jnp.float32),
        "w2": 0.1 * jax.random.normal(ks[1], (c, c, 1), jnp.float32),
        "gamma1": 1.0 + 0.1 * jax.random.normal(ks[2], (c,), jnp.float32),
        "beta1": 0.1 * jax.random.normal(ks[3], (c,), jnp.float32),
        "mean1": 0.1 * jax.random.normal(ks[4], (c,), jnp.float32),
        "var1": 1.0 + 0.5 * jnp.abs(jax.random.normal(ks[5], (c,), jnp.float32)),
        "gamma2": 1.0 + 0.1 * jax.random.normal(ks[6], (c,), jnp.float32),
        "beta2": 0.1 * jax.random.normal(ks[7], (c,), jnp.float32),
        "mean2": 0.05 * jnp.ones((c,), jnp.float32),
        "var2": 1.25 * jnp.ones((c,), jnp.float32),
    }


if __name__ == "__main__":
    key = jax.random.PRNGKey(0)
    k_x, k_p = jax.random.split(key)

    b, n, s, d = 2, 8, 8, 16          # (batch, groups, samples-per-group, d)
    in_channels, out_channels = d, 32

    x = jax.random.normal(k_x, (b, n, s, d), jnp.float32)
    params = make_params(k_p, in_channels, out_channels)

    out = jax.block_until_ready(local_op_forward(x, params))
    ref = jax.block_until_ready(local_op_reference(x, params))

    assert out.shape == (b, out_channels, n), out.shape
    # bf16 inputs/weights -> loosened tolerance vs the f32 reference.
    assert jnp.allclose(out, ref, atol=2e-2, rtol=2e-2), "mismatch vs reference"
    print("KERNEL_OK")
</pallas_src>

<mosaic_0001>
module attributes {stable_mosaic.version = 11 : i64} {
  func.func @_local_op_kernel(%arg0: i32, %arg1: memref<128x16xbf16, #tpu.memory_space<vmem>>, %arg2: memref<16x32xbf16, #tpu.memory_space<vmem>>, %arg3: memref<32x32xbf16, #tpu.memory_space<vmem>>, %arg4: memref<1x32xf32, #tpu.memory_space<vmem>>, %arg5: memref<1x32xf32, #tpu.memory_space<vmem>>, %arg6: memref<32x16xf32, #tpu.memory_space<vmem>>) attributes {dimension_semantics = [#tpu.dimension_semantics<parallel>], iteration_bounds = array<i64: 1>, scalar_prefetch = 0 : i64, scratch_operands = 0 : i64, tpu.core_type = #tpu.core_type<tc>, window_params = [{transform_indices = @transform_0, window_bounds = array<i64: 128, 16>}, {pipeline_mode = #tpu.pipeline_mode<synchronous>, transform_indices = @transform_1, window_bounds = array<i64: 16, 32>}, {pipeline_mode = #tpu.pipeline_mode<synchronous>, transform_indices = @transform_2, window_bounds = array<i64: 32, 32>}, {pipeline_mode = #tpu.pipeline_mode<synchronous>, transform_indices = @transform_3, window_bounds = array<i64: 1, 32>}, {pipeline_mode = #tpu.pipeline_mode<synchronous>, transform_indices = @transform_4, window_bounds = array<i64: 1, 32>}, {transform_indices = @transform_5, window_bounds = array<i64: 32, 16>}]} {
    %c0 = arith.constant 0 : index
    %c0_0 = arith.constant 0 : index
    %0 = vector.load %arg1[%c0, %c0_0] : memref<128x16xbf16, #tpu.memory_space<vmem>>, vector<128x16xbf16>
    %c0_1 = arith.constant 0 : index
    %c0_2 = arith.constant 0 : index
    %1 = vector.load %arg2[%c0_1, %c0_2] : memref<16x32xbf16, #tpu.memory_space<vmem>>, vector<16x32xbf16>
    %cst = arith.constant dense<0.000000e+00> : vector<128x32xf32>
    %2 = tpu.matmul %0, %1, %cst {dimension_numbers = #tpu.dot_dimension_numbers<[1], [0], [0], [1], [0, 0, 1, 1], [], []>} : vector<128x16xbf16>, vector<16x32xbf16>, vector<128x32xf32> -> vector<128x32xf32>
    %c0_3 = arith.constant 0 : index
    %c0_4 = arith.constant 0 : index
    %3 = vector.load %arg4[%c0_3, %c0_4] : memref<1x32xf32, #tpu.memory_space<vmem>>, vector<1x32xf32>
    %4 = vector.broadcast %3 : vector<1x32xf32> to vector<128x32xf32>
    %5 = arith.addf %2, %4 : vector<128x32xf32>
    %cst_5 = arith.constant 0.000000e+00 : f32
    %6 = vector.broadcast %cst_5 : f32 to vector<128x32xf32>
    %7 = arith.maximumf %5, %6 : vector<128x32xf32>
    %8 = arith.truncf %7 : vector<128x32xf32> to vector<128x32xbf16>
    %c0_6 = arith.constant 0 : index
    %c0_7 = arith.constant 0 : index
    %9 = vector.load %arg3[%c0_6, %c0_7] : memref<32x32xbf16, #tpu.memory_space<vmem>>, vector<32x32xbf16>
    %cst_8 = arith.constant dense<0.000000e+00> : vector<128x32xf32>
    %10 = tpu.matmul %8, %9, %cst_8 {dimension_numbers = #tpu.dot_dimension_numbers<[1], [0], [0], [1], [0, 0, 1, 1], [], []>} : vector<128x32xbf16>, vector<32x32xbf16>, vector<128x32xf32> -> vector<128x32xf32>
    %c0_9 = arith.constant 0 : index
    %c0_10 = arith.constant 0 : index
    %11 = vector.load %arg5[%c0_9, %c0_10] : memref<1x32xf32, #tpu.memory_space<vmem>>, vector<1x32xf32>
    %12 = vector.broadcast %11 : vector<1x32xf32> to vector<128x32xf32>
    %13 = arith.addf %10, %12 : vector<128x32xf32>
    %cst_11 = arith.constant 0.000000e+00 : f32
    %14 = vector.broadcast %cst_11 : f32 to vector<128x32xf32>
    %15 = arith.maximumf %13, %14 : vector<128x32xf32>
    %16 = vector.shape_cast %15 : vector<128x32xf32> to vector<16x8x32xf32>
    %cst_12 = arith.constant dense<0xFF800000> : vector<16x32xf32>
    %17 = vector.multi_reduction <maximumf>, %16, %cst_12 [1] : vector<16x8x32xf32> to vector<16x32xf32>
    %18 = tpu.transpose %17, [1, 0] : vector<16x32xf32> -> vector<32x16xf32>
    %c0_13 = arith.constant 0 : index
    %c0_14 = arith.constant 0 : index
    %19 = vector.load %arg6[%c0_13, %c0_14] : memref<32x16xf32, #tpu.memory_space<vmem>>, vector<32x16xf32>
    tpu.vector_store %arg6[%c0_13, %c0_14], %18 {strides = array<i32>} : memref<32x16xf32, #tpu.memory_space<vmem>>, vector<32x16xf32>,
    return
  }
  func.func @transform_0(%arg0: i32) -> (i32, i32) {
    %c0_i32 = arith.constant 0 : i32
    %c0_i32_0 = arith.constant 0 : i32
    return %arg0, %c0_i32 : i32, i32
  }
  func.func @transform_1(%arg0: i32) -> (i32, i32) {
    %c0_i32 = arith.constant 0 : i32
    %c0_i32_0 = arith.constant 0 : i32
    %c0_i32_1 = arith.constant 0 : i32
    return %c0_i32, %c0_i32_0 : i32, i32
  }
  func.func @transform_2(%arg0: i32) -> (i32, i32) {
    %c0_i32 = arith.constant 0 : i32
    %c0_i32_0 = arith.constant 0 : i32
    %c0_i32_1 = arith.constant 0 : i32
    return %c0_i32, %c0_i32_0 : i32, i32
  }
  func.func @transform_3(%arg0: i32) -> (i32, i32) {
    %c0_i32 = arith.constant 0 : i32
    %c0_i32_0 = arith.constant 0 : i32
    %c0_i32_1 = arith.constant 0 : i32
    return %c0_i32, %c0_i32_0 : i32, i32
  }
  func.func @transform_4(%arg0: i32) -> (i32, i32) {
    %c0_i32 = arith.constant 0 : i32
    %c0_i32_0 = arith.constant 0 : i32
    %c0_i32_1 = arith.constant 0 : i32
    return %c0_i32, %c0_i32_0 : i32, i32
  }
  func.func @transform_5(%arg0: i32) -> (i32, i32) {
    %c0_i32 = arith.constant 0 : i32
    %c0_i32_0 = arith.constant 0 : i32
    return %c0_i32, %arg0 : i32, i32
  }
}

</mosaic_0001>

<bundles_post_ra>
// kernel: tpu_custom_call.1
= control target key start
LH: loop header
LB: loop body
LE: loop exit
PB: predicated region body
PF: predicated region fallthrough
CT: control target
= control target key end

     0   :  { %vm92_vm0 = vcmask 130048   ;;  %vm261_vm1 = vcmask 261120   ;;  %vm527_vm2 = vcmask 1041409   ;;  %vm529_vm3 = vcmask 1042434   ;;  %s853_s1 = inlined_call_operand.vmem [shape: bf16[16,32], index: 1, kind: input, shape index: {}]   ;;  %s854_s0 = inlined_call_operand.vmem [shape: bf16[128,16], index: 0, kind: input, shape index: {}]   ;;  %s855_s2 = inlined_call_operand.vmem [shape: bf16[32,32], index: 2, kind: input, shape index: {}]   ;;  %s856_s3 = inlined_call_operand.vmem [shape: f32[1,32], index: 3, kind: input, shape index: {}]   ;;  %s857_s4 = inlined_call_operand.vmem [shape: f32[1,32], index: 4, kind: input, shape index: {}]   ;;  %s858_s5 = inlined_call_operand.vmem [shape: f32[32,16], index: 5, kind: output, shape index: {}]  }
   0x1   :  { %v677_v0 = vld [vmem:[%s853_s1] sm:$0xff]   ;;  %v679_v2 = vld [vmem:[%s854_s0 + $0x8] sm:$0xff]   ;;  %v680_v3 = vld [vmem:[%s854_s0 + $0x10] sm:$0xff]   ;;  %vm531_vm4 = vcmask 1043459   ;;  %vm533_vm5 = vcmask 1044484   ;;  %vm535_vm6 = vcmask 1045509  }
   0x2   :  { %v678_v1 = vld [vmem:[%s854_s0] sm:$0xff]   ;;  %638 = vmatprep.subr.bf16.mxu0 %v677_v0  ;;  %v681_v4 = vld [vmem:[%s854_s0 + $0x18] sm:$0xff]   ;;  %v683_v6 = vld [vmem:[%s854_s0 + $0x28] sm:$0xff]   ;;  %vm537_vm7 = vcmask 1046534   ;;  %vm539_vm8 = vcmask 1047559  }
   0x3   :  { %639 = vmatpush3.bf16.msra.mxu0 %v677_v0  ;;  %640 = vmatprep.mubr.msk.bf16.mxu0 %vm92_vm0, %v678_v1  ;;  %v682_v5 = vld [vmem:[%s854_s0 + $0x20] sm:$0xff]   ;;  %v684_v7 = vld [vmem:[%s854_s0 + $0x30] sm:$0xff]   ;;  %v685_v8 = vld [vmem:[%s854_s0 + $0x38] sm:$0xff]  }
   0x4   :  { %v686_v9 = vld [vmem:[%s855_s2 + $0x8] sm:$0xff]   ;;  %v687_v10 = vld [vmem:[%s855_s2] sm:$0xff]  }
   0x5   :  { %656 = vmatprep.subr.bf16.mxu1 %v686_v9  ;;  %v590_v13 = vld [vmem:[%s856_s3] ss:$0 sm:$0xff] }
   0x6   :  { %641 = vmatmul.mubr.msk.bf16.vlgmr.msra.gmra.mxu0 %vm92_vm0, %v679_v2  ;;  %657 = vmatpush3.bf16.msra.mxu1 %v686_v9 }
   0x7   :  { %644 = vmatprep.mubr.msk.bf16.mxu0 %vm92_vm0, %v680_v3  ;;  %658 = vmatprep.subr.bf16.mxu1 %v687_v10 }
   0xa   :  { %659 = vmatpush3.bf16.msra.mxu1 %v687_v10 }
   0xe   :  { %645 = vmatmul.mubr.msk.bf16.gmra.mxu0 %vm92_vm0, %v681_v4  ;;  %v773_v4 = vld [vmem:[%s857_s4] ss:$0 sm:$0xff] }
   0xf   :  { %648 = vmatprep.mubr.msk.bf16.mxu0 %vm92_vm0, %v682_v5 }
  0x16   :  { %649 = vmatmul.mubr.msk.bf16.gmra.mxu0 %vm92_vm0, %v683_v6 }
  0x17   :  { %652 = vmatprep.mubr.msk.bf16.mxu0 %vm92_vm0, %v684_v7 }
  0x1e   :  { %653 = vmatmul.mubr.msk.bf16.gmra.mxu0 %vm92_vm0, %v685_v8 }
  0xc6   :  { %v642_v11 = vpop.f32.mrf.mxu0 }
  0xc7   :  { %v160_v17 = vadd.f32 %v642_v11, %v590_v13 }
  0xc8   :  { %v151_v12 = vpop.f32.mrf.mxu0 }
  0xc9   :  { %v152_v15 = vadd.f32 %v590_v13, %v151_v12  ;;  %v216_v24 = vmax.f32 %v160_v17, 0.0 }
  0xca   :  { %v643_v14 = vpop.f32.mrf.mxu0 }
  0xcb   :  { %v163_v16 = vadd.f32 %v643_v14, %v590_v13  ;;  %v214_v22 = vmax.f32 %v152_v15, 0.0 }
  0xcc   :  { %v154_v18 = vpop.f32.mrf.mxu0 }
  0xcd   :  { %v155_v19 = vadd.f32 %v590_v13, %v154_v18  ;;  %v217_v20 = vmax.f32 %v163_v16, 0.0 }
  0xce   :  { %v646_v21 = vpop.f32.mrf.mxu0 }
  0xcf   :  { %v215_v23 = vmax.f32 %v155_v19, 0.0  ;;  %v231_v27 = vpack.c.bf16 %v217_v20, %v216_v24  ;;  %v176_v31 = vadd.f32 %v646_v21, %v590_v13 }
  0xd0   :  { %v167_v25 = vpop.f32.mrf.mxu0 }
  0xd1   :  { %v230_v26 = vpack.c.bf16 %v215_v23, %v214_v22  ;;  %v168_v29 = vadd.f32 %v590_v13, %v167_v25  ;;  %v220_v38 = vmax.f32 %v176_v31, 0.0 }
  0xd2   :  { %v647_v28 = vpop.f32.mrf.mxu0 }
  0xd3   :  { %v179_v30 = vadd.f32 %v647_v28, %v590_v13  ;;  %660 = vmatprep.mubr.msk.bf16.mxu1 %vm261_vm1, %v230_v26  ;;  %v218_v36 = vmax.f32 %v168_v29, 0.0 }
  0xd4   :  { %v170_v32 = vpop.f32.mrf.mxu0  ;;  %661 = vmatmul.mubr.msk.bf16.vlgmr.msra.gmra.mxu1 %vm261_vm1, %v231_v27 }
  0xd5   :  { %v171_v33 = vadd.f32 %v590_v13, %v170_v32  ;;  %v221_v34 = vmax.f32 %v179_v30, 0.0 }
  0xd6   :  { %v650_v35 = vpop.f32.mrf.mxu0 }
  0xd7   :  { %v219_v37 = vmax.f32 %v171_v33, 0.0  ;;  %v233_v41 = vpack.c.bf16 %v221_v34, %v220_v38  ;;  %v192_v45 = vadd.f32 %v650_v35, %v590_v13 }
  0xd8   :  { %v183_v39 = vpop.f32.mrf.mxu0 }
  0xd9   :  { %v232_v40 = vpack.c.bf16 %v219_v37, %v218_v36  ;;  %v184_v43 = vadd.f32 %v590_v13, %v183_v39  ;;  %v224_v52 = vmax.f32 %v192_v45, 0.0 }
  0xda   :  { %v651_v42 = vpop.f32.mrf.mxu0 }
  0xdb   :  { %v195_v44 = vadd.f32 %v651_v42, %v590_v13  ;;  %664 = vmatprep.mubr.msk.bf16.mxu1 %vm261_vm1, %v232_v40  ;;  %v222_v50 = vmax.f32 %v184_v43, 0.0 }
  0xdc   :  { %v186_v46 = vpop.f32.mrf.mxu0  ;;  %665 = vmatmul.mubr.msk.bf16.gmra.mxu1 %vm261_vm1, %v233_v41 }
  0xdd   :  { %v187_v47 = vadd.f32 %v590_v13, %v186_v46  ;;  %v225_v48 = vmax.f32 %v195_v44, 0.0 }
  0xde   :  { %v654_v49 = vpop.f32.mrf.mxu0 }
  0xdf   :  { %v223_v51 = vmax.f32 %v187_v47, 0.0  ;;  %v235_v55 = vpack.c.bf16 %v225_v48, %v224_v52  ;;  %v208_v59 = vadd.f32 %v654_v49, %v590_v13 }
  0xe0   :  { %v199_v53 = vpop.f32.mrf.mxu0 }
  0xe1   :  { %v234_v54 = vpack.c.bf16 %v223_v51, %v222_v50  ;;  %v200_v57 = vadd.f32 %v590_v13, %v199_v53  ;;  %v228_v1 = vmax.f32 %v208_v59, 0.0 }
  0xe2   :  { %v655_v56 = vpop.f32.mrf.mxu0 }
  0xe3   :  { %v211_v58 = vadd.f32 %v655_v56, %v590_v13  ;;  %668 = vmatprep.mubr.msk.bf16.mxu1 %vm261_vm1, %v234_v54  ;;  %v226_v63 = vmax.f32 %v200_v57, 0.0 }
  0xe4   :  { %v202_v60 = vpop.f32.mrf.mxu0  ;;  %669 = vmatmul.mubr.msk.bf16.gmra.mxu1 %vm261_vm1, %v235_v55 }
  0xe5   :  { %v203_v61 = vadd.f32 %v590_v13, %v202_v60  ;;  %v229_v62 = vmax.f32 %v211_v58, 0.0 }
  0xe7   :  { %v227_v0 = vmax.f32 %v203_v61, 0.0  ;;  %v237_v3 = vpack.c.bf16 %v229_v62, %v228_v1 }
  0xe9   :  { %v236_v2 = vpack.c.bf16 %v227_v0, %v226_v63 }
  0xeb   :  { %672 = vmatprep.mubr.msk.bf16.mxu1 %vm261_vm1, %v236_v2 }
  0xec   :  { %673 = vmatmul.mubr.msk.bf16.gmra.mxu1 %vm261_vm1, %v237_v3 }
 0x194   :  { %v662_v5 = vpop.f32.mrf.mxu1 }
 0x195   :  { %v329_v6 = vadd.f32 %v662_v5, %v773_v4 }
 0x196   :  { %v320_v7 = vpop.f32.mrf.mxu1 }
 0x197   :  { %v385_v8 = vmax.f32 %v329_v6, 0.0  ;;  %v321_v9 = vadd.f32 %v773_v4, %v320_v7 }
 0x198   :  { %v663_v10 = vpop.f32.mrf.mxu1 }
 0x199   :  { %v413_v11 = vsel %vm261_vm1, %v385_v8, -inf  ;;  %v383_v12 = vmax.f32 %v321_v9, 0.0  ;;  %v332_v13 = vadd.f32 %v663_v10, %v773_v4 }
 0x19a   :  { %v414_v14 = vrot.slane %v413_v11, 4  ;;  %v323_v15 = vpop.f32.mrf.mxu1 }
 0x19b   :  { %v399_v16 = vsel %vm261_vm1, %v383_v12, -inf  ;;  %v386_v17 = vmax.f32 %v332_v13, 0.0  ;;  %v324_v18 = vadd.f32 %v773_v4, %v323_v15 }
 0x19c   :  { %v415_v19 = vmax.f32 %v413_v11, %v414_v14  ;;  %v400_v20 = vrot.slane %v399_v16, 4  ;;  %v666_v21 = vpop.f32.mrf.mxu1 }
 0x19d   :  { %v420_v22 = vsel %vm261_vm1, %v386_v17, -inf  ;;  %v384_v23 = vmax.f32 %v324_v18, 0.0  ;;  %v345_v24 = vadd.f32 %v666_v21, %v773_v4 }
 0x19e   :  { %v416_v25 = vrot.slane %v415_v19, 2  ;;  %v401_v26 = vmax.f32 %v399_v16, %v400_v20  ;;  %v421_v27 = vrot.slane %v420_v22, 4  ;;  %v336_v28 = vpop.f32.mrf.mxu1 }
 0x19f   :  { %v406_v29 = vsel %vm261_vm1, %v384_v23, -inf  ;;  %v389_v30 = vmax.f32 %v345_v24, 0.0  ;;  %v337_v31 = vadd.f32 %v773_v4, %v336_v28 }
 0x1a0   :  { %v402_v32 = vrot.slane %v401_v26, 2  ;;  %v422_v33 = vmax.f32 %v420_v22, %v421_v27  ;;  %v407_v34 = vrot.slane %v406_v29, 4  ;;  %v667_v35 = vpop.f32.mrf.mxu1  ;;  %v417_v39 = vmax.f32 %v415_v19, %v416_v25 }
 0x1a1   :  { %v441_v36 = vsel %vm261_vm1, %v389_v30, -inf  ;;  %v387_v37 = vmax.f32 %v337_v31, 0.0  ;;  %v348_v38 = vadd.f32 %v667_v35, %v773_v4 }
 0x1a2   :  { %v403_v40 = vmax.f32 %v401_v26, %v402_v32  ;;  %v423_v41 = vrot.slane %v422_v33, 2  ;;  %v408_v42 = vmax.f32 %v406_v29, %v407_v34  ;;  %v339_v43 = vpop.f32.mrf.mxu1  ;;  %v442_v44 = vrot.slane %v441_v36, 4 }
 0x1a3   :  { %v427_v45 = vsel %vm261_vm1, %v387_v37, -inf  ;;  %v390_v46 = vmax.f32 %v348_v38, 0.0  ;;  %v340_v47 = vadd.f32 %v773_v4, %v339_v43  ;;  %v418_v55 = vrot.slane %v417_v39, 1 }
 0x1a4   :  { %v424_v48 = vmax.f32 %v422_v33, %v423_v41  ;;  %v409_v49 = vrot.slane %v408_v42, 2  ;;  %v670_v50 = vpop.f32.mrf.mxu1  ;;  %v443_v51 = vmax.f32 %v441_v36, %v442_v44  ;;  %v428_v52 = vrot.slane %v427_v45, 4 }
 0x1a5   :  { %v448_v53 = vsel %vm261_vm1, %v390_v46, -inf  ;;  %v388_v54 = vmax.f32 %v340_v47, 0.0  ;;  %v404_v56 = vrot.slane %v403_v40, 1  ;;  %v361_v63 = vadd.f32 %v670_v50, %v773_v4 }
 0x1a6   :  { %v410_v57 = vmax.f32 %v408_v42, %v409_v49  ;;  %v449_v58 = vrot.slane %v448_v53, 4  ;;  %v352_v59 = vpop.f32.mrf.mxu1  ;;  %v444_v60 = vrot.slane %v443_v51, 2  ;;  %v429_v61 = vmax.f32 %v427_v45, %v428_v52 }
 0x1a7   :  { %v434_v62 = vsel %vm261_vm1, %v388_v54, -inf  ;;  %v425_v0 = vrot.slane %v424_v48, 1  ;;  %v393_v7 = vmax.f32 %v361_v63, 0.0  ;;  %v353_v8 = vadd.f32 %v773_v4, %v352_v59 }
 0x1a8   :  { %v411_v1 = vrot.slane %v410_v57, 1  ;;  %v792_v2 = vmax.f32 %v448_v53, %v449_v58  ;;  %v435_v3 = vrot.slane %v434_v62, 4  ;;  %v671_v5 = vpop.f32.mrf.mxu1  ;;  %v794_v6 = vmax.f32 %v443_v51, %v444_v60 }
 0x1a9   :  { %v797_v9 = vmax.f32 %v417_v39, %v418_v55  ;;  %v430_v10 = vrot.slane %v429_v61, 2  ;;  %v364_v12 = vadd.f32 %v671_v5, %v773_v4  ;;  %v405_v14 = vmax.f32 %v403_v40, %v404_v56 }
 0x1aa   :  { %v436_v11 = vmax.f32 %v434_v62, %v435_v3  ;;  %v355_v13 = vpop.f32.mrf.mxu1  ;;  %v412_v15 = vmax.f32 %v410_v57, %v411_v1  ;;  %v469_v16 = vsel %vm261_vm1, %v393_v7, -inf  ;;  %v391_v17 = vmax.f32 %v353_v8, 0.0 }
 0x1ab   :  { %v801_v18 = vmax.f32 %v424_v48, %v425_v0  ;;  %v451_v19 = vrot.slane %v792_v2, 2  ;;  %v470_v21 = vrot.slane %v469_v16, 4  ;;  %v446_v23 = vrot.slane %v794_v6, 1 }
 0x1ac   :  { %v437_v20 = vrot.slane %v436_v11, 2  ;;  %v674_v22 = vpop.f32.mrf.mxu1  ;;  %v455_v24 = vsel %vm261_vm1, %v391_v17, -inf  ;;  %v394_v25 = vmax.f32 %v364_v12, 0.0  ;;  %v356_v26 = vadd.f32 %v773_v4, %v355_v13 }
 0x1ad   :  { %v431_v27 = vmax.f32 %v429_v61, %v430_v10  ;;  %v471_v28 = vmax.f32 %v469_v16, %v470_v21  ;;  %v456_v29 = vrot.slane %v455_v24, 4  ;;  %v377_v30 = vadd.f32 %v674_v22, %v773_v4 }
 0x1ae   :  { %v368_v31 = vpop.f32.mrf.mxu1  ;;  %v528_v32 = vsel %vm527_vm2, %v412_v15, %v405_v14  ;;  %v476_v33 = vsel %vm261_vm1, %v394_v25, -inf  ;;  %v392_v34 = vmax.f32 %v356_v26, 0.0  ;;  %v438_v36 = vmax.f32 %v436_v11, %v437_v20 }
 0x1af   :  { %v369_v35 = vadd.f32 %v773_v4, %v368_v31  ;;  %v472_v37 = vrot.slane %v471_v28, 2  ;;  %v457_v38 = vmax.f32 %v455_v24, %v456_v29  ;;  %v477_v39 = vrot.slane %v476_v33, 4 }
 0x1b0   :  { %v675_v40 = vpop.f32.mrf.mxu1  ;;  %v462_v41 = vsel %vm261_vm1, %v392_v34, -inf  ;;  %v397_v42 = vmax.f32 %v377_v30, 0.0  ;;  %v432_v45 = vrot.slane %v431_v27, 1  ;;  %v439_v54 = vrot.slane %v438_v36, 1 }
 0x1b1   :  { %v395_v43 = vmax.f32 %v369_v35, 0.0  ;;  %v380_v44 = vadd.f32 %v675_v40, %v773_v4  ;;  %v473_v46 = vmax.f32 %v471_v28, %v472_v37  ;;  %v458_v47 = vrot.slane %v457_v38, 2 }
 0x1b2   :  { %v478_v48 = vmax.f32 %v476_v33, %v477_v39  ;;  %v371_v49 = vpop.f32.mrf.mxu1  ;;  %v463_v50 = vrot.slane %v462_v41, 4  ;;  %v497_v51 = vsel %vm261_vm1, %v397_v42, -inf  ;;  %v452_v62 = vmax.f32 %v792_v2, %v451_v19 }
 0x1b3   :  { %v483_v52 = vsel %vm261_vm1, %v395_v43, -inf  ;;  %v398_v53 = vmax.f32 %v380_v44, 0.0  ;;  %v459_v55 = vmax.f32 %v457_v38, %v458_v47  ;;  %v498_v57 = vrot.slane %v497_v51, 4 }
 0x1b4   :  { %v479_v56 = vrot.slane %v478_v48, 2  ;;  %v464_v58 = vmax.f32 %v462_v41, %v463_v50  ;;  %v484_v59 = vrot.slane %v483_v52, 4  ;;  %v372_v61 = vadd.f32 %v773_v4, %v371_v49 }
 0x1b5   :  { %v504_v60 = vsel %vm261_vm1, %v398_v53, -inf  ;;  %v474_v63 = vrot.slane %v473_v46, 1  ;;  %v460_v0 = vrot.slane %v459_v55, 1  ;;  %v499_v1 = vmax.f32 %v497_v51, %v498_v57 }
 0x1b6   :  { %v465_v3 = vrot.slane %v464_v58, 2  ;;  %v485_v5 = vmax.f32 %v483_v52, %v484_v59  ;;  %v505_v7 = vrot.slane %v504_v60, 4  ;;  %v396_v8 = vmax.f32 %v372_v61, 0.0 }
 0x1b7   :  { %v433_v10 = vmax.f32 %v431_v27, %v432_v45  ;;  %v440_v11 = vmax.f32 %v438_v36, %v439_v54  ;;  %v480_v12 = vmax.f32 %v478_v48, %v479_v56  ;;  %v500_v13 = vrot.slane %v499_v1, 2 }
 0x1b8   :  { %v466_v14 = vmax.f32 %v464_v58, %v465_v3  ;;  %v486_v15 = vrot.slane %v485_v5, 2  ;;  %v506_v16 = vmax.f32 %v504_v60, %v505_v7  ;;  %v490_v17 = vsel %vm261_vm1, %v396_v8, -inf }
 0x1b9   :  { %v475_v4 = vmax.f32 %v473_v46, %v474_v63  ;;  %v461_v20 = vmax.f32 %v459_v55, %v460_v0  ;;  %v491_v21 = vrot.slane %v490_v17, 4  ;;  %v453_v2 = vrot.slane %v452_v62, 1 }
 0x1ba   :  { %v467_v19 = vrot.slane %v466_v14, 1  ;;  %v487_v22 = vmax.f32 %v485_v5, %v486_v15  ;;  %v507_v24 = vrot.slane %v506_v16, 2  ;;  %v530_v25 = vsel %vm529_vm3, %v797_v9, %v528_v32 }
 0x1bb   :  { %v481_v26 = vrot.slane %v480_v12, 1  ;;  %v492_v27 = vmax.f32 %v490_v17, %v491_v21  ;;  %v447_v28 = vmax.f32 %v794_v6, %v446_v23  ;;  %v532_v29 = vsel %vm531_vm4, %v801_v18, %v530_v25 }
 0x1bc   :  { %v468_v30 = vmax.f32 %v466_v14, %v467_v19  ;;  %v501_v31 = vmax.f32 %v499_v1, %v500_v13  ;;  %v488_v33 = vrot.slane %v487_v22, 1  ;;  %v534_v34 = vsel %vm533_vm5, %v433_v10, %v532_v29 }
 0x1bd   :  { %v508_v35 = vmax.f32 %v506_v16, %v507_v24  ;;  %v493_v36 = vrot.slane %v492_v27, 2  ;;  %v454_v37 = vmax.f32 %v452_v62, %v453_v2  ;;  %v536_v38 = vsel %vm535_vm6, %v440_v11, %v534_v34 }
 0x1be   :  { %v541_v9 = vsel %vm527_vm2, %v468_v30, %v461_v20  ;;  %v538_v32 = vsel %vm537_vm7, %v447_v28, %v536_v38  ;;  %v482_v39 = vmax.f32 %v480_v12, %v481_v26  ;;  %v502_v23 = vrot.slane %v501_v31, 1 }
 0x1bf   :  { %v494_v40 = vmax.f32 %v492_v27, %v493_v36  ;;  %v540_v6 = vsel %vm539_vm8, %v454_v37, %v538_v32  ;;  %v542_v18 = vsel %vm529_vm3, %v475_v4, %v541_v9  ;;  %v489_v41 = vmax.f32 %v487_v22, %v488_v33 }
 0x1c0   :  { %550 = vxpose.xlu0.b32.start [1/2] (short) (narrow) %v540_v6, 32  ;;  %v509_v43 = vrot.slane %v508_v35, 1  ;;  %v543_v44 = vsel %vm531_vm4, %v482_v39, %v542_v18  ;;  %v503_v46 = vmax.f32 %v501_v31, %v502_v23 }
 0x1c1   :  { %v495_v42 = vrot.slane %v494_v40, 1  ;;  %v544_v47 = vsel %vm533_vm5, %v489_v41, %v543_v44 }
 0x1c2   :  { %v510_v48 = vmax.f32 %v508_v35, %v509_v43 }
 0x1c3   :  { %v496_v45 = vmax.f32 %v494_v40, %v495_v42 }
 0x1c5   :  { %v545_v49 = vsel %vm535_vm6, %v496_v45, %v544_v47 }
 0x1c6   :  { %v546_v50 = vsel %vm537_vm7, %v503_v46, %v545_v49 }
 0x1c7   :  { %v547_v51 = vsel %vm539_vm8, %v510_v48, %v546_v50 }
 0x1c8   :  { %551 = vxpose.xlu0.b32.end [2/2] (short) (narrow) %v547_v51, 32 }
 0x240   :  { %v566_v52 = vpop.trf.xlu0 }
 0x241   :  { %582 = vst.msk [vmem:[%s858_s5] sm:$0xff] %vm92_vm0, %v566_v52 }
 0x244   :  { %v567_v53 = vpop.trf.xlu0 }
 0x245   :  { %583 = vst.msk [vmem:[%s858_s5 + $0x8] sm:$0xff] %vm92_vm0, %v567_v53 }
 0x248   :  { %v568_v54 = vpop.trf.xlu0 }
 0x249   :  { %584 = vst.msk [vmem:[%s858_s5 + $0x10] sm:$0xff] %vm92_vm0, %v568_v54 }
 0x24c   :  { %v569_v55 = vpop.trf.xlu0 }
 0x24d   :  { %585 = vst.msk [vmem:[%s858_s5 + $0x18] sm:$0xff] %vm92_vm0, %v569_v55 }

</bundles_post_ra>
